<compile_context>
chip_gen: v7x
topology: tpu7x:2x2x1
jax: 0.10.0
libtpu: 0.0.40
codegen_flags: <defaults>
</compile_context>

<pallas_src>
import functools

import jax
import jax.numpy as jnp
from jax.experimental import pallas as pl
from jax.experimental.pallas import tpu as pltpu

_DMA_DEPTH = 8  # row-gather DMAs kept in flight per token block


def _gather_kernel(ids_ref, table_ref, out_ref, scratch, sem):
    # ids_ref:   (N_pad,) int32 in SMEM (scalar prefetch)
    # table_ref: (V, D) in HBM (memory_space=pl.ANY), gathered row by row
    # out_ref:   (TM, D) VMEM output tile for this token block
    # scratch:   (TM, D) VMEM gather buffer
    # sem:       (_DMA_DEPTH,) DMA semaphores (ring)
    tm = out_ref.shape[0]
    base = pl.program_id(0) * tm

    def issue(i):
        tok = ids_ref[base + i]
        pltpu.make_async_copy(
            table_ref.at[pl.ds(tok, 1)],      # (1, D) row in HBM
            scratch.at[pl.ds(i, 1)],          # (1, D) row in VMEM
            sem.at[i & (_DMA_DEPTH - 1)],
        ).start()

    # Prime the ring with the first _DMA_DEPTH row fetches.
    for i in range(min(_DMA_DEPTH, tm)):
        issue(i)

    def body(i, carry):
        slot = i & (_DMA_DEPTH - 1)
        # Wait for row i (same transfer shape / semaphore as when issued).
        pltpu.make_async_copy(
            table_ref.at[pl.ds(0, 1)],
            scratch.at[pl.ds(0, 1)],
            sem.at[slot],
        ).wait()

        # Refill the slot with the fetch for row i + _DMA_DEPTH, if any.
        @pl.when(i + _DMA_DEPTH < tm)
        def _():
            tok = ids_ref[base + i + _DMA_DEPTH]
            pltpu.make_async_copy(
                table_ref.at[pl.ds(tok, 1)],
                scratch.at[pl.ds(i + _DMA_DEPTH, 1)],
                sem.at[slot],
            ).start()

        return carry

    jax.lax.fori_loop(0, tm, body, 0)

    # All rows gathered; hand the tile to the pipelined output writeback.
    out_ref[...] = scratch[...]


@functools.partial(jax.jit, static_argnames=("block_tokens",))
def token_embedding(x, table, *, block_tokens=256):
    """x: (B, S) integer token ids; table: (V, D). Returns (B, S, D)."""
    B, S = x.shape
    V, D = table.shape
    N = B * S
    itemsize = jnp.dtype(table.dtype).itemsize

    # Clamp ids (matches jnp gather; also guards the HBM row DMA).
    ids_flat = jnp.clip(x.reshape(N).astype(jnp.int32), 0, V - 1)

    # Block size: up to `block_tokens` rows, multiple of 8 (sublane tiling).
    tm = min(block_tokens, ((N + 7) // 8) * 8)
    n_pad = ((N + tm - 1) // tm) * tm
    if n_pad != N:
        # Padded ids gather row 0; those rows are sliced off below.
        ids_flat = jnp.pad(ids_flat, (0, n_pad - N))

    cost = pl.CostEstimate(
        flops=0,
        transcendentals=0,
        bytes_accessed=2 * n_pad * D * itemsize + n_pad * 4,  # read rows + write out + ids
    )

    out_flat = pl.pallas_call(
        _gather_kernel,
        out_shape=jax.ShapeDtypeStruct((n_pad, D), table.dtype),
        grid_spec=pltpu.PrefetchScalarGridSpec(
            num_scalar_prefetch=1,                 # ids -> SMEM
            grid=(n_pad // tm,),
            in_specs=[pl.BlockSpec(memory_space=pl.ANY)],   # table stays in HBM
            out_specs=pl.BlockSpec((tm, D), lambda b, ids: (b, 0)),
            scratch_shapes=[
                pltpu.VMEM((tm, D), table.dtype),
                pltpu.SemaphoreType.DMA((_DMA_DEPTH,)),
            ],
        ),
        compiler_params=pltpu.CompilerParams(
            dimension_semantics=("parallel",),      # independent token blocks
            vmem_limit_bytes=32 * 1024 * 1024,
        ),
        cost_estimate=cost,
    )(ids_flat, table)

    return out_flat[:N].reshape(B, S, D)


if __name__ == "__main__":
    vocab_size = 256
    embedding_dim = 128
    B, S = 2, 8

    key = jax.random.PRNGKey(0)
    k_tab, k_ids = jax.random.split(key)

    # nn.Embedding weight init: N(0, 1), shape (vocab_size, embedding_dim)
    table = jax.random.normal(k_tab, (vocab_size, embedding_dim), dtype=jnp.float32)
    x = jax.random.randint(k_ids, (B, S), 0, vocab_size, dtype=jnp.int32)

    out = token_embedding(x, table)
    jax.block_until_ready(out)

    # correctness check against plain JAX gather
    ref = table[x]
    assert out.shape == (B, S, embedding_dim)
    assert jnp.allclose(out, ref, atol=1e-6), "mismatch vs reference gather"

    print("KERNEL_OK")
</pallas_src>

<mosaic_0001>
module attributes {stable_mosaic.version = 11 : i64} {
  func.func @_gather_kernel(%arg0: i32, %arg1: memref<16xi32, #tpu.memory_space<smem>>, %arg2: memref<256x128xf32, #tpu.memory_space<any>>, %arg3: memref<16x128xf32, #tpu.memory_space<vmem>>, %arg4: memref<16x128xf32, #tpu.memory_space<vmem>>, %arg5: memref<8x!tpu.dma_semaphore, #tpu.memory_space<semaphore_mem>>) attributes {dimension_semantics = [#tpu.dimension_semantics<parallel>], iteration_bounds = array<i64: 1>, scalar_prefetch = 1 : i64, scratch_operands = 2 : i64, tpu.core_type = #tpu.core_type<tc>, window_params = [{}, {transform_indices = @transform_1, window_bounds = array<i64: 16, 128>}]} {
    %c16_i32 = arith.constant 16 : i32
    %0 = arith.muli %arg0, %c16_i32 : i32
    %c0_i32 = arith.constant 0 : i32
    %1 = arith.addi %0, %c0_i32 : i32
    %2 = arith.index_cast %1 : i32 to index
    %3 = memref.load %arg1[%2] : memref<16xi32, #tpu.memory_space<smem>>
    %c0_i32_0 = arith.constant 0 : i32
    %c0_i32_1 = arith.constant 0 : i32
    %4 = tpu.memref_slice %arg2[%3, %c0_i32_1] : memref<256x128xf32, #tpu.memory_space<any>> -> memref<1x128xf32, #tpu.memory_space<any>>
    %c0_i32_2 = arith.constant 0 : i32
    %c0_i32_3 = arith.constant 0 : i32
    %5 = tpu.memref_slice %arg4[%c0_i32_2, %c0_i32_3] : memref<16x128xf32, #tpu.memory_space<vmem>> -> memref<1x128xf32, #tpu.memory_space<vmem>>
    %6 = tpu.memref_slice %arg5[%c0_i32_0] : memref<8x!tpu.dma_semaphore, #tpu.memory_space<semaphore_mem>> -> memref<1x!tpu.dma_semaphore, #tpu.memory_space<semaphore_mem>>
    %7 = tpu.memref_squeeze %6 : memref<1x!tpu.dma_semaphore, #tpu.memory_space<semaphore_mem>> -> memref<!tpu.dma_semaphore, #tpu.memory_space<semaphore_mem>>
    tpu.enqueue_dma source(%4 : memref<1x128xf32, #tpu.memory_space<any>>) target(%5 : memref<1x128xf32, #tpu.memory_space<vmem>>) target_semaphore(%7 : memref<!tpu.dma_semaphore, #tpu.memory_space<semaphore_mem>>)
    %c1_i32 = arith.constant 1 : i32
    %8 = arith.addi %0, %c1_i32 : i32
    %9 = arith.index_cast %8 : i32 to index
    %10 = memref.load %arg1[%9] : memref<16xi32, #tpu.memory_space<smem>>
    %c1_i32_4 = arith.constant 1 : i32
    %c0_i32_5 = arith.constant 0 : i32
    %11 = tpu.memref_slice %arg2[%10, %c0_i32_5] : memref<256x128xf32, #tpu.memory_space<any>> -> memref<1x128xf32, #tpu.memory_space<any>>
    %c1_i32_6 = arith.constant 1 : i32
    %c0_i32_7 = arith.constant 0 : i32
    %12 = tpu.memref_slice %arg4[%c1_i32_6, %c0_i32_7] : memref<16x128xf32, #tpu.memory_space<vmem>> -> memref<1x128xf32, #tpu.memory_space<vmem>>
    %13 = tpu.memref_slice %arg5[%c1_i32_4] : memref<8x!tpu.dma_semaphore, #tpu.memory_space<semaphore_mem>> -> memref<1x!tpu.dma_semaphore, #tpu.memory_space<semaphore_mem>>
    %14 = tpu.memref_squeeze %13 : memref<1x!tpu.dma_semaphore, #tpu.memory_space<semaphore_mem>> -> memref<!tpu.dma_semaphore, #tpu.memory_space<semaphore_mem>>
    tpu.enqueue_dma source(%11 : memref<1x128xf32, #tpu.memory_space<any>>) target(%12 : memref<1x128xf32, #tpu.memory_space<vmem>>) target_semaphore(%14 : memref<!tpu.dma_semaphore, #tpu.memory_space<semaphore_mem>>)
    %c2_i32 = arith.constant 2 : i32
    %15 = arith.addi %0, %c2_i32 : i32
    %16 = arith.index_cast %15 : i32 to index
    %17 = memref.load %arg1[%16] : memref<16xi32, #tpu.memory_space<smem>>
    %c2_i32_8 = arith.constant 2 : i32
    %c0_i32_9 = arith.constant 0 : i32
    %18 = tpu.memref_slice %arg2[%17, %c0_i32_9] : memref<256x128xf32, #tpu.memory_space<any>> -> memref<1x128xf32, #tpu.memory_space<any>>
    %c2_i32_10 = arith.constant 2 : i32
    %c0_i32_11 = arith.constant 0 : i32
    %19 = tpu.memref_slice %arg4[%c2_i32_10, %c0_i32_11] : memref<16x128xf32, #tpu.memory_space<vmem>> -> memref<1x128xf32, #tpu.memory_space<vmem>>
    %20 = tpu.memref_slice %arg5[%c2_i32_8] : memref<8x!tpu.dma_semaphore, #tpu.memory_space<semaphore_mem>> -> memref<1x!tpu.dma_semaphore, #tpu.memory_space<semaphore_mem>>
    %21 = tpu.memref_squeeze %20 : memref<1x!tpu.dma_semaphore, #tpu.memory_space<semaphore_mem>> -> memref<!tpu.dma_semaphore, #tpu.memory_space<semaphore_mem>>
    tpu.enqueue_dma source(%18 : memref<1x128xf32, #tpu.memory_space<any>>) target(%19 : memref<1x128xf32, #tpu.memory_space<vmem>>) target_semaphore(%21 : memref<!tpu.dma_semaphore, #tpu.memory_space<semaphore_mem>>)
    %c3_i32 = arith.constant 3 : i32
    %22 = arith.addi %0, %c3_i32 : i32
    %23 = arith.index_cast %22 : i32 to index
    %24 = memref.load %arg1[%23] : memref<16xi32, #tpu.memory_space<smem>>
    %c3_i32_12 = arith.constant 3 : i32
    %c0_i32_13 = arith.constant 0 : i32
    %25 = tpu.memref_slice %arg2[%24, %c0_i32_13] : memref<256x128xf32, #tpu.memory_space<any>> -> memref<1x128xf32, #tpu.memory_space<any>>
    %c3_i32_14 = arith.constant 3 : i32
    %c0_i32_15 = arith.constant 0 : i32
    %26 = tpu.memref_slice %arg4[%c3_i32_14, %c0_i32_15] : memref<16x128xf32, #tpu.memory_space<vmem>> -> memref<1x128xf32, #tpu.memory_space<vmem>>
    %27 = tpu.memref_slice %arg5[%c3_i32_12] : memref<8x!tpu.dma_semaphore, #tpu.memory_space<semaphore_mem>> -> memref<1x!tpu.dma_semaphore, #tpu.memory_space<semaphore_mem>>
    %28 = tpu.memref_squeeze %27 : memref<1x!tpu.dma_semaphore, #tpu.memory_space<semaphore_mem>> -> memref<!tpu.dma_semaphore, #tpu.memory_space<semaphore_mem>>
    tpu.enqueue_dma source(%25 : memref<1x128xf32, #tpu.memory_space<any>>) target(%26 : memref<1x128xf32, #tpu.memory_space<vmem>>) target_semaphore(%28 : memref<!tpu.dma_semaphore, #tpu.memory_space<semaphore_mem>>)
    %c4_i32 = arith.constant 4 : i32
    %29 = arith.addi %0, %c4_i32 : i32
    %30 = arith.index_cast %29 : i32 to index
    %31 = memref.load %arg1[%30] : memref<16xi32, #tpu.memory_space<smem>>
    %c4_i32_16 = arith.constant 4 : i32
    %c0_i32_17 = arith.constant 0 : i32
    %32 = tpu.memref_slice %arg2[%31, %c0_i32_17] : memref<256x128xf32, #tpu.memory_space<any>> -> memref<1x128xf32, #tpu.memory_space<any>>
    %c4_i32_18 = arith.constant 4 : i32
    %c0_i32_19 = arith.constant 0 : i32
    %33 = tpu.memref_slice %arg4[%c4_i32_18, %c0_i32_19] : memref<16x128xf32, #tpu.memory_space<vmem>> -> memref<1x128xf32, #tpu.memory_space<vmem>>
    %34 = tpu.memref_slice %arg5[%c4_i32_16] : memref<8x!tpu.dma_semaphore, #tpu.memory_space<semaphore_mem>> -> memref<1x!tpu.dma_semaphore, #tpu.memory_space<semaphore_mem>>
    %35 = tpu.memref_squeeze %34 : memref<1x!tpu.dma_semaphore, #tpu.memory_space<semaphore_mem>> -> memref<!tpu.dma_semaphore, #tpu.memory_space<semaphore_mem>>
    tpu.enqueue_dma source(%32 : memref<1x128xf32, #tpu.memory_space<any>>) target(%33 : memref<1x128xf32, #tpu.memory_space<vmem>>) target_semaphore(%35 : memref<!tpu.dma_semaphore, #tpu.memory_space<semaphore_mem>>)
    %c5_i32 = arith.constant 5 : i32
    %36 = arith.addi %0, %c5_i32 : i32
    %37 = arith.index_cast %36 : i32 to index
    %38 = memref.load %arg1[%37] : memref<16xi32, #tpu.memory_space<smem>>
    %c5_i32_20 = arith.constant 5 : i32
    %c0_i32_21 = arith.constant 0 : i32
    %39 = tpu.memref_slice %arg2[%38, %c0_i32_21] : memref<256x128xf32, #tpu.memory_space<any>> -> memref<1x128xf32, #tpu.memory_space<any>>
    %c5_i32_22 = arith.constant 5 : i32
    %c0_i32_23 = arith.constant 0 : i32
    %40 = tpu.memref_slice %arg4[%c5_i32_22, %c0_i32_23] : memref<16x128xf32, #tpu.memory_space<vmem>> -> memref<1x128xf32, #tpu.memory_space<vmem>>
    %41 = tpu.memref_slice %arg5[%c5_i32_20] : memref<8x!tpu.dma_semaphore, #tpu.memory_space<semaphore_mem>> -> memref<1x!tpu.dma_semaphore, #tpu.memory_space<semaphore_mem>>
    %42 = tpu.memref_squeeze %41 : memref<1x!tpu.dma_semaphore, #tpu.memory_space<semaphore_mem>> -> memref<!tpu.dma_semaphore, #tpu.memory_space<semaphore_mem>>
    tpu.enqueue_dma source(%39 : memref<1x128xf32, #tpu.memory_space<any>>) target(%40 : memref<1x128xf32, #tpu.memory_space<vmem>>) target_semaphore(%42 : memref<!tpu.dma_semaphore, #tpu.memory_space<semaphore_mem>>)
    %c6_i32 = arith.constant 6 : i32
    %43 = arith.addi %0, %c6_i32 : i32
    %44 = arith.index_cast %43 : i32 to index
    %45 = memref.load %arg1[%44] : memref<16xi32, #tpu.memory_space<smem>>
    %c6_i32_24 = arith.constant 6 : i32
    %c0_i32_25 = arith.constant 0 : i32
    %46 = tpu.memref_slice %arg2[%45, %c0_i32_25] : memref<256x128xf32, #tpu.memory_space<any>> -> memref<1x128xf32, #tpu.memory_space<any>>
    %c6_i32_26 = arith.constant 6 : i32
    %c0_i32_27 = arith.constant 0 : i32
    %47 = tpu.memref_slice %arg4[%c6_i32_26, %c0_i32_27] : memref<16x128xf32, #tpu.memory_space<vmem>> -> memref<1x128xf32, #tpu.memory_space<vmem>>
    %48 = tpu.memref_slice %arg5[%c6_i32_24] : memref<8x!tpu.dma_semaphore, #tpu.memory_space<semaphore_mem>> -> memref<1x!tpu.dma_semaphore, #tpu.memory_space<semaphore_mem>>
    %49 = tpu.memref_squeeze %48 : memref<1x!tpu.dma_semaphore, #tpu.memory_space<semaphore_mem>> -> memref<!tpu.dma_semaphore, #tpu.memory_space<semaphore_mem>>
    tpu.enqueue_dma source(%46 : memref<1x128xf32, #tpu.memory_space<any>>) target(%47 : memref<1x128xf32, #tpu.memory_space<vmem>>) target_semaphore(%49 : memref<!tpu.dma_semaphore, #tpu.memory_space<semaphore_mem>>)
    %c7_i32 = arith.constant 7 : i32
    %50 = arith.addi %0, %c7_i32 : i32
    %51 = arith.index_cast %50 : i32 to index
    %52 = memref.load %arg1[%51] : memref<16xi32, #tpu.memory_space<smem>>
    %c7_i32_28 = arith.constant 7 : i32
    %c0_i32_29 = arith.constant 0 : i32
    %53 = tpu.memref_slice %arg2[%52, %c0_i32_29] : memref<256x128xf32, #tpu.memory_space<any>> -> memref<1x128xf32, #tpu.memory_space<any>>
    %c7_i32_30 = arith.constant 7 : i32
    %c0_i32_31 = arith.constant 0 : i32
    %54 = tpu.memref_slice %arg4[%c7_i32_30, %c0_i32_31] : memref<16x128xf32, #tpu.memory_space<vmem>> -> memref<1x128xf32, #tpu.memory_space<vmem>>
    %55 = tpu.memref_slice %arg5[%c7_i32_28] : memref<8x!tpu.dma_semaphore, #tpu.memory_space<semaphore_mem>> -> memref<1x!tpu.dma_semaphore, #tpu.memory_space<semaphore_mem>>
    %56 = tpu.memref_squeeze %55 : memref<1x!tpu.dma_semaphore, #tpu.memory_space<semaphore_mem>> -> memref<!tpu.dma_semaphore, #tpu.memory_space<semaphore_mem>>
    tpu.enqueue_dma source(%53 : memref<1x128xf32, #tpu.memory_space<any>>) target(%54 : memref<1x128xf32, #tpu.memory_space<vmem>>) target_semaphore(%56 : memref<!tpu.dma_semaphore, #tpu.memory_space<semaphore_mem>>)
    %c0_i32_32 = arith.constant 0 : i32
    %c16_i32_33 = arith.constant 16 : i32
    %57 = arith.addi %c0_i32_32, %c16_i32_33 : i32
    %c1_i32_34 = arith.constant 1 : i32
    scf.for %arg6 = %c0_i32_32 to %57 step %c1_i32_34  : i32 {
      %c7_i32_39 = arith.constant 7 : i32
      %60 = arith.andi %arg6, %c7_i32_39 : i32
      %c0_i32_40 = arith.constant 0 : i32
      %c0_i32_41 = arith.constant 0 : i32
      %61 = tpu.memref_slice %arg2[%c0_i32_40, %c0_i32_41] : memref<256x128xf32, #tpu.memory_space<any>> -> memref<1x128xf32, #tpu.memory_space<any>>
      %c0_i32_42 = arith.constant 0 : i32
      %c0_i32_43 = arith.constant 0 : i32
      %62 = tpu.memref_slice %arg4[%c0_i32_42, %c0_i32_43] : memref<16x128xf32, #tpu.memory_space<vmem>> -> memref<1x128xf32, #tpu.memory_space<vmem>>
      %63 = tpu.memref_slice %arg5[%60] : memref<8x!tpu.dma_semaphore, #tpu.memory_space<semaphore_mem>> -> memref<1x!tpu.dma_semaphore, #tpu.memory_space<semaphore_mem>>
      %64 = tpu.memref_squeeze %63 : memref<1x!tpu.dma_semaphore, #tpu.memory_space<semaphore_mem>> -> memref<!tpu.dma_semaphore, #tpu.memory_space<semaphore_mem>>
      tpu.wait_dma2 semaphore(%64 : memref<!tpu.dma_semaphore, #tpu.memory_space<semaphore_mem>>) src(%61 : memref<1x128xf32, #tpu.memory_space<any>>) dst(%62 : memref<1x128xf32, #tpu.memory_space<vmem>>)
      %c8_i32 = arith.constant 8 : i32
      %65 = arith.addi %arg6, %c8_i32 : i32
      %c16_i32_44 = arith.constant 16 : i32
      %66 = arith.cmpi slt, %65, %c16_i32_44 : i32
      %67 = arith.extui %66 : i1 to i32
      %c0_i32_45 = arith.constant 0 : i32
      %68 = arith.cmpi ne, %67, %c0_i32_45 : i32
      scf.if %68 {
        %69 = arith.addi %0, %arg6 : i32
        %c8_i32_46 = arith.constant 8 : i32
        %70 = arith.addi %69, %c8_i32_46 : i32
        %71 = arith.index_cast %70 : i32 to index
        %72 = memref.load %arg1[%71] : memref<16xi32, #tpu.memory_space<smem>>
        %c8_i32_47 = arith.constant 8 : i32
        %73 = arith.addi %arg6, %c8_i32_47 : i32
        %c0_i32_48 = arith.constant 0 : i32
        %74 = tpu.memref_slice %arg2[%72, %c0_i32_48] : memref<256x128xf32, #tpu.memory_space<any>> -> memref<1x128xf32, #tpu.memory_space<any>>
        %c0_i32_49 = arith.constant 0 : i32
        %75 = tpu.memref_slice %arg4[%73, %c0_i32_49] : memref<16x128xf32, #tpu.memory_space<vmem>> -> memref<1x128xf32, #tpu.memory_space<vmem>>
        %76 = tpu.memref_slice %arg5[%60] : memref<8x!tpu.dma_semaphore, #tpu.memory_space<semaphore_mem>> -> memref<1x!tpu.dma_semaphore, #tpu.memory_space<semaphore_mem>>
        %77 = tpu.memref_squeeze %76 : memref<1x!tpu.dma_semaphore, #tpu.memory_space<semaphore_mem>> -> memref<!tpu.dma_semaphore, #tpu.memory_space<semaphore_mem>>
        tpu.enqueue_dma source(%74 : memref<1x128xf32, #tpu.memory_space<any>>) target(%75 : memref<1x128xf32, #tpu.memory_space<vmem>>) target_semaphore(%77 : memref<!tpu.dma_semaphore, #tpu.memory_space<semaphore_mem>>)
      } else {
      }
    }
    %c16_i32_35 = arith.constant 16 : i32
    %c0 = arith.constant 0 : index
    %c0_36 = arith.constant 0 : index
    %58 = vector.load %arg4[%c0, %c0_36] : memref<16x128xf32, #tpu.memory_space<vmem>>, vector<16x128xf32>
    %c0_37 = arith.constant 0 : index
    %c0_38 = arith.constant 0 : index
    %59 = vector.load %arg3[%c0_37, %c0_38] : memref<16x128xf32, #tpu.memory_space<vmem>>, vector<16x128xf32>
    tpu.vector_store %arg3[%c0_37, %c0_38], %58 {strides = array<i32>} : memref<16x128xf32, #tpu.memory_space<vmem>>, vector<16x128xf32>,
    return
  }
  func.func @transform_1(%arg0: i32, %arg1: memref<16xi32, #tpu.memory_space<smem>>) -> (i32, i32) {
    %c0_i32 = arith.constant 0 : i32
    %c0_i32_0 = arith.constant 0 : i32
    return %arg0, %c0_i32 : i32, i32
  }
}

</mosaic_0001>

<bundles_post_ra>
// kernel: token_embedding.1
= control target key start
LH: loop header
LB: loop body
LE: loop exit
PB: predicated region body
PF: predicated region fallthrough
CT: control target
= control target key end

     0   :  { %s809_s0 = inlined_call_operand.vmem [shape: s32[16], index: 0, kind: input, shape index: {}]   ;;  %s810_s1 = inlined_call_operand.hbm [shape: f32[256,128], index: 1, kind: input, shape index: {}]   ;;  %s811_s2 = inlined_call_operand.hbm [shape: f32[16,128], index: 2, kind: output, shape index: {}]  }
   0x1   :  { %s7_s11 = sshll.u32 %s809_s0, 4  ;;  %s8_s11 = int_to_ptr.vmem [resolvable:$true] %s7_s11 }
   0x2   :  { %s332_s12 = scalar_lea.vmem %s8_s11, 16  ;;  %p337_p1 = scmp.lt.s32.totalorder %s8_s11, %s8_s11 }
   0x3   :  { %p333_p0 = scmp.ne.s32.totalorder %s8_s11, %s332_s12  ;;  %p338_p2 = scmp.lt.s32.totalorder %s332_s12, %s332_s12 }
   0x5   :  { %p339_p3 = por %p338_p2, %p337_p1 }
   0x7   :  { %p340_p4 = pnand %p339_p3, %p333_p0 }
   0x9   :  { %343 = shalt.err (!%p340_p4)  }
   0xa   :  { %s600_s13 = smov [#allocation5]  }
   0xb   :  { %10 = dma.vmem_to_smem %s8_s11, 16, %s600_s13, [#allocation4] }
   0xc   :  { %590 = dma.done.wait [#allocation4], 16 }
   0xd   :  { %591 = vsyncadd [#allocation4], 4294967280 }
   0xe   :  { %12 = sfence }
   0xf   :  { %13 = vsyncpa [#allocation7], 0  ;;  %s15_s14 = sld [smem:[#allocation5]]  ;;  %s601_s15 = smov [#allocation2]  }
  0x10   :  { %s25_s16 = sshll.u32 %s601_s15, 4  ;;  %s630_s17 = sld [smem:[#allocation5 + $0x1]]  ;;  %s632_s16 = int_to_ptr.vmem [resolvable:$true] %s25_s16 }
  0x11   :  { %s602_s0 = smov [#allocation2 + $0x1]   ;;  %s634_s19 = sld [smem:[#allocation5 + $0x2]] }
  0x12   :  { %s42_s18 = sshll.u32 %s602_s0, 4  ;;  %s603_s20 = smov [#allocation2 + $0x2]   ;;  %s636_s18 = int_to_ptr.vmem [resolvable:$true] %s42_s18 }
  0x13   :  { %s59_s21 = sshll.u32 %s603_s20, 4  ;;  %s638_s22 = sld [smem:[#allocation5 + $0x3]]  ;;  %s640_s21 = int_to_ptr.vmem [resolvable:$true] %s59_s21 }
  0x14   :  { %s649_s3 = scalar_lea.hbm %s810_s1, 4096 }
  0x15   :  { %s282_s23 = sshll.u32 %s15_s14, 4 }
  0x16   :  { %s17_s26 = scalar_lea.hbm %s810_s1, %s282_s23  ;;  %s284_s27 = sshll.u32 %s630_s17, 4 }
  0x17   :  { %s344_s28 = scalar_lea.hbm %s17_s26, 16  ;;  %p347_p6 = scmp.lt.u32.totalorder %s17_s26, %s810_s1 }
  0x18   :  { %p345_p5 = scmp.ne.s32.totalorder %s17_s26, %s344_s28  ;;  %p348_p7 = scmp.lt.u32.totalorder %s649_s3, %s344_s28 }
  0x19   :  { %p350_p9 = scmp.lt.u32.totalorder %s344_s28, %s17_s26 }
  0x1a   :  { %p349_p8 = por %p348_p7, %p347_p6 }
  0x1c   :  { %p351_p10 = por %p350_p9, %p349_p8 }
  0x1e   :  { %p352_p11 = pnand %p351_p10, %p345_p5 }
  0x20   :  { %355 = shalt.err (!%p352_p11)  }
  0x21   :  { %s356_s6 = scalar_lea.vmem %s632_s16, 16  ;;  %s658_s7 = scalar_lea.vmem %s632_s16, 256 }
  0x22   :  { %p357_p12 = scmp.ne.s32.totalorder %s632_s16, %s356_s6  ;;  %p361_p13 = scmp.lt.s32.totalorder %s632_s16, %s632_s16 }
  0x23   :  { %p362_p0 = scmp.lt.s32.totalorder %s658_s7, %s356_s6 }
  0x25   :  { %p363_p1 = por %p362_p0, %p361_p13 }
  0x27   :  { %p364_p2 = pnand %p363_p1, %p357_p12 }
  0x29   :  { %367 = shalt.err (!%p364_p2)  }
  0x2a   :  { %28 = dma.hbm_to_vmem [thread:$0]  %s17_s26, 16, %s632_s16, [#allocation3] }
  0x2b   :  { %s32_s10 = scalar_lea.hbm %s810_s1, %s284_s27  ;;  %s286_s11 = sshll.u32 %s634_s19, 4 }
  0x2c   :  { %s368_s12 = scalar_lea.hbm %s32_s10, 16  ;;  %p371_p4 = scmp.lt.u32.totalorder %s32_s10, %s810_s1 }
  0x2d   :  { %p369_p3 = scmp.ne.s32.totalorder %s32_s10, %s368_s12  ;;  %p372_p5 = scmp.lt.u32.totalorder %s649_s3, %s368_s12 }
  0x2e   :  { %p374_p7 = scmp.lt.u32.totalorder %s368_s12, %s32_s10 }
  0x2f   :  { %p373_p6 = por %p372_p5, %p371_p4 }
  0x31   :  { %p375_p8 = por %p374_p7, %p373_p6 }
  0x33   :  { %p376_p9 = pnand %p375_p8, %p369_p3 }
  0x35   :  { %379 = shalt.err (!%p376_p9)  }
  0x36   :  { %s380_s15 = scalar_lea.vmem %s636_s18, 16  ;;  %p385_p11 = scmp.lt.s32.totalorder %s636_s18, %s632_s16 }
  0x37   :  { %p381_p10 = scmp.ne.s32.totalorder %s636_s18, %s380_s15  ;;  %p386_p12 = scmp.lt.s32.totalorder %s658_s7, %s380_s15 }
  0x39   :  { %p387_p13 = por %p386_p12, %p385_p11 }
  0x3b   :  { %p388_p0 = pnand %p387_p13, %p381_p10 }
  0x3d   :  { %391 = shalt.err (!%p388_p0)  }
  0x3e   :  { %45 = dma.hbm_to_vmem [thread:$0]  %s32_s10, 16, %s636_s18, [#allocation3 + $0x1] }
  0x3f   :  { %s49_s19 = scalar_lea.hbm %s810_s1, %s286_s11  ;;  %s288_s20 = sshll.u32 %s638_s22, 4 }
  0x40   :  { %s392_s23 = scalar_lea.hbm %s49_s19, 16  ;;  %p395_p2 = scmp.lt.u32.totalorder %s49_s19, %s810_s1 }
  0x41   :  { %p393_p1 = scmp.ne.s32.totalorder %s49_s19, %s392_s23  ;;  %p396_p3 = scmp.lt.u32.totalorder %s649_s3, %s392_s23 }
  0x42   :  { %p398_p5 = scmp.lt.u32.totalorder %s392_s23, %s49_s19 }
  0x43   :  { %p397_p4 = por %p396_p3, %p395_p2 }
  0x45   :  { %p399_p6 = por %p398_p5, %p397_p4 }
  0x47   :  { %p400_p7 = pnand %p399_p6, %p393_p1 }
  0x49   :  { %403 = shalt.err (!%p400_p7)  }
  0x4a   :  { %s404_s18 = scalar_lea.vmem %s640_s21, 16  ;;  %p409_p9 = scmp.lt.s32.totalorder %s640_s21, %s632_s16 }
  0x4b   :  { %p405_p8 = scmp.ne.s32.totalorder %s640_s21, %s404_s18  ;;  %p410_p10 = scmp.lt.s32.totalorder %s658_s7, %s404_s18 }
  0x4d   :  { %p411_p11 = por %p410_p10, %p409_p9 }
  0x4f   :  { %p412_p12 = pnand %p411_p11, %p405_p8 }
  0x51   :  { %415 = shalt.err (!%p412_p12)  }
  0x52   :  { %62 = dma.hbm_to_vmem [thread:$0]  %s49_s19, 16, %s640_s21, [#allocation3 + $0x2] }
  0x53   :  { %s66_s27 = scalar_lea.hbm %s810_s1, %s288_s20  ;;  %s604_s28 = smov [#allocation2 + $0x3]  }
  0x54   :  { %s76_s29 = sshll.u32 %s604_s28, 4  ;;  %s695_s30 = sld [smem:[#allocation5 + $0x4]]  ;;  %s77_s29 = int_to_ptr.vmem [resolvable:$true] %s76_s29 }
  0x55   :  { %s416_s4 = scalar_lea.hbm %s66_s27, 16  ;;  %p419_p0 = scmp.lt.u32.totalorder %s66_s27, %s810_s1 }
  0x56   :  { %p417_p13 = scmp.ne.s32.totalorder %s66_s27, %s416_s4  ;;  %p420_p1 = scmp.lt.u32.totalorder %s649_s3, %s416_s4 }
  0x57   :  { %p422_p3 = scmp.lt.u32.totalorder %s416_s4, %s66_s27 }
  0x58   :  { %p421_p2 = por %p420_p1, %p419_p0 }
  0x5a   :  { %p423_p4 = por %p422_p3, %p421_p2 }
  0x5c   :  { %p424_p5 = pnand %p423_p4, %p417_p13 }
  0x5e   :  { %427 = shalt.err (!%p424_p5)  }
  0x5f   :  { %s428_s21 = scalar_lea.vmem %s77_s29, 16  ;;  %p433_p7 = scmp.lt.s32.totalorder %s77_s29, %s632_s16 }
  0x60   :  { %p429_p6 = scmp.ne.s32.totalorder %s77_s29, %s428_s21  ;;  %p434_p8 = scmp.lt.s32.totalorder %s658_s7, %s428_s21 }
  0x62   :  { %p435_p9 = por %p434_p8, %p433_p7 }
  0x64   :  { %p436_p10 = pnand %p435_p9, %p429_p6 }
  0x66   :  { %439 = shalt.err (!%p436_p10)  }
  0x67   :  { %79 = dma.hbm_to_vmem [thread:$0]  %s66_s27, 16, %s77_s29, [#allocation3 + $0x3] }
  0x68   :  { %s605_s8 = smov [#allocation2 + $0x4]   ;;  %s703_s10 = sld [smem:[#allocation5 + $0x5]] }
  0x69   :  { %s93_s9 = sshll.u32 %s605_s8, 4  ;;  %s606_s11 = smov [#allocation2 + $0x5]   ;;  %s94_s9 = int_to_ptr.vmem [resolvable:$true] %s93_s9 }
  0x6a   :  { %s110_s12 = sshll.u32 %s606_s11, 4  ;;  %s705_s13 = sld [smem:[#allocation5 + $0x6]]  ;;  %s708_s12 = int_to_ptr.vmem [resolvable:$true] %s110_s12 }
  0x6b   :  { %s290_s14 = sshll.u32 %s695_s30, 4 }
  0x6c   :  { %s83_s0 = scalar_lea.hbm %s810_s1, %s290_s14 }
  0x6d   :  { %s440_s19 = scalar_lea.hbm %s83_s0, 16  ;;  %p443_p12 = scmp.lt.u32.totalorder %s83_s0, %s810_s1 }
  0x6e   :  { %p441_p11 = scmp.ne.s32.totalorder %s83_s0, %s440_s19  ;;  %p444_p13 = scmp.lt.u32.totalorder %s649_s3, %s440_s19 }
  0x6f   :  { %p446_p1 = scmp.lt.u32.totalorder %s440_s19, %s83_s0 }
  0x70   :  { %p445_p0 = por %p444_p13, %p443_p12 }
  0x72   :  { %p447_p2 = por %p446_p1, %p445_p0 }
  0x74   :  { %p448_p3 = pnand %p447_p2, %p441_p11 }
  0x76   :  { %451 = shalt.err (!%p448_p3)  }
  0x77   :  { %s452_s24 = scalar_lea.vmem %s94_s9, 16  ;;  %p457_p5 = scmp.lt.s32.totalorder %s94_s9, %s632_s16 }
  0x78   :  { %p453_p4 = scmp.ne.s32.totalorder %s94_s9, %s452_s24  ;;  %p458_p6 = scmp.lt.s32.totalorder %s658_s7, %s452_s24 }
  0x7a   :  { %p459_p7 = por %p458_p6, %p457_p5 }
  0x7c   :  { %p460_p8 = pnand %p459_p7, %p453_p4 }
  0x7e   :  { %463 = shalt.err (!%p460_p8)  }
  0x7f   :  { %96 = dma.hbm_to_vmem [thread:$0]  %s83_s0, 16, %s94_s9, [#allocation3 + $0x4] }
  0x80   :  { %s292_s25 = sshll.u32 %s703_s10, 4  ;;  %s607_s18 = smov [#allocation2 + $0x6]  }
  0x81   :  { %s127_s22 = sshll.u32 %s607_s18, 4  ;;  %s100_s28 = scalar_lea.hbm %s810_s1, %s292_s25  ;;  %s723_s22 = int_to_ptr.vmem [resolvable:$true] %s127_s22 }
  0x82   :  { %s464_s29 = scalar_lea.hbm %s100_s28, 16  ;;  %p467_p10 = scmp.lt.u32.totalorder %s100_s28, %s810_s1 }
  0x83   :  { %p465_p9 = scmp.ne.s32.totalorder %s100_s28, %s464_s29  ;;  %p468_p11 = scmp.lt.u32.totalorder %s649_s3, %s464_s29 }
  0x84   :  { %p470_p13 = scmp.lt.u32.totalorder %s464_s29, %s100_s28 }
  0x85   :  { %p469_p12 = por %p468_p11, %p467_p10 }
  0x87   :  { %p471_p0 = por %p470_p13, %p469_p12 }
  0x89   :  { %p472_p1 = pnand %p471_p0, %p465_p9 }
  0x8b   :  { %475 = shalt.err (!%p472_p1)  }
  0x8c   :  { %s476_s5 = scalar_lea.vmem %s708_s12, 16  ;;  %p481_p3 = scmp.lt.s32.totalorder %s708_s12, %s632_s16 }
  0x8d   :  { %p477_p2 = scmp.ne.s32.totalorder %s708_s12, %s476_s5  ;;  %p482_p4 = scmp.lt.s32.totalorder %s658_s7, %s476_s5 }
  0x8f   :  { %p483_p5 = por %p482_p4, %p481_p3 }
  0x91   :  { %p484_p6 = pnand %p483_p5, %p477_p2 }
  0x93   :  { %487 = shalt.err (!%p484_p6)  }
  0x94   :  { %113 = dma.hbm_to_vmem [thread:$0]  %s100_s28, 16, %s708_s12, [#allocation3 + $0x5] }
  0x95   :  { %s294_s6 = sshll.u32 %s705_s13, 4  ;;  %s295_s21 = sld [smem:[#allocation5 + $0x7]] }
  0x96   :  { %s117_s10 = scalar_lea.hbm %s810_s1, %s294_s6 }
  0x97   :  { %s488_s11 = scalar_lea.hbm %s117_s10, 16  ;;  %p491_p8 = scmp.lt.u32.totalorder %s117_s10, %s810_s1 }
  0x98   :  { %p489_p7 = scmp.ne.s32.totalorder %s117_s10, %s488_s11  ;;  %p492_p9 = scmp.lt.u32.totalorder %s649_s3, %s488_s11 }
  0x99   :  { %p494_p11 = scmp.lt.u32.totalorder %s488_s11, %s117_s10 }
  0x9a   :  { %p493_p10 = por %p492_p9, %p491_p8 }
  0x9c   :  { %p495_p12 = por %p494_p11, %p493_p10 }
  0x9e   :  { %p496_p13 = pnand %p495_p12, %p489_p7 }
  0xa0   :  { %499 = shalt.err (!%p496_p13)  }
  0xa1   :  { %s500_s12 = scalar_lea.vmem %s723_s22, 16  ;;  %p505_p1 = scmp.lt.s32.totalorder %s723_s22, %s632_s16 }
  0xa2   :  { %p501_p0 = scmp.ne.s32.totalorder %s723_s22, %s500_s12  ;;  %p506_p2 = scmp.lt.s32.totalorder %s658_s7, %s500_s12 }
  0xa4   :  { %p507_p3 = por %p506_p2, %p505_p1 }
  0xa6   :  { %p508_p4 = pnand %p507_p3, %p501_p0 }
  0xa8   :  { %511 = shalt.err (!%p508_p4)  }
  0xa9   :  { %130 = dma.hbm_to_vmem [thread:$0]  %s117_s10, 16, %s723_s22, [#allocation3 + $0x6] }
  0xaa   :  { %s608_s13 = smov [#allocation2 + $0x7]   ;;  %s296_s0 = sshll.u32 %s295_s21, 4 }
  0xab   :  { %s144_s17 = sshll.u32 %s608_s13, 4  ;;  %s134_s23 = scalar_lea.hbm %s810_s1, %s296_s0  ;;  %s145_s17 = int_to_ptr.vmem [resolvable:$true] %s144_s17 }
  0xac   :  { %s512_s24 = scalar_lea.hbm %s134_s23, 16  ;;  %p515_p6 = scmp.lt.u32.totalorder %s134_s23, %s810_s1 }
  0xad   :  { %p513_p5 = scmp.ne.s32.totalorder %s134_s23, %s512_s24  ;;  %p516_p7 = scmp.lt.u32.totalorder %s649_s3, %s512_s24 }
  0xae   :  { %p518_p9 = scmp.lt.u32.totalorder %s512_s24, %s134_s23 }
  0xaf   :  { %p517_p8 = por %p516_p7, %p515_p6 }
  0xb1   :  { %p519_p10 = por %p518_p9, %p517_p8 }
  0xb3   :  { %p520_p11 = pnand %p519_p10, %p513_p5 }
  0xb5   :  { %523 = shalt.err (!%p520_p11)  }
  0xb6   :  { %s524_s22 = scalar_lea.vmem %s145_s17, 16  ;;  %p529_p13 = scmp.lt.s32.totalorder %s145_s17, %s632_s16 }
  0xb7   :  { %p525_p12 = scmp.ne.s32.totalorder %s145_s17, %s524_s22  ;;  %p530_p0 = scmp.lt.s32.totalorder %s658_s7, %s524_s22 }
  0xb9   :  { %p531_p1 = por %p530_p0, %p529_p13 }
  0xbb   :  { %p532_p2 = pnand %p531_p1, %p525_p12 }
  0xbd   :  { %535 = shalt.err (!%p532_p2)  }
  0xbe   :  { %147 = dma.hbm_to_vmem [thread:$0]  %s134_s23, 16, %s145_s17, [#allocation3 + $0x7] }
  0xbf   :  { %s758_s26 = smov 0  }
  0xc0 LB: > { %s154_s27 = sand.u32 7, %s598_s26  ;;  %s598_s26 = sphi %s758_s26, %s153_s26  }
  0xc1   : > { %s764_s28 = scalar_lea.sflag [#allocation3], %s154_s27 }
  0xc2   : > { %592 = dma.done.wait %s764_s28, 16 }
  0xc3   : > { %593 = vsyncadd %s764_s28, 4294967280  ;;  %s159_s29 = sadd.s32 8, %s598_s26  ;;  %s275_s5 = scalar_lea.vmem [#allocation2], %s598_s26 }
  0xc4   : > { %p769_p3 = scmp.lt.s32.totalorder %s159_s29, 16  ;;  %s276_s6 = scalar_lea.vmem %s275_s5, 8 [#allocation2] }
  0xc5   : > { %s177_s8 = sshll.u32 %s276_s6, 4  ;;  %s178_s8 = int_to_ptr.vmem [resolvable:$true] %s177_s8 }
  0xc6   : > { %s308_s4 = scalar_select %p769_p3, [#allocation5], [#allocation28] }
  0xc7   : > { %s814_s29 = smov (!%p769_p3, %s159_s29), 0 }
  0xc8   : > { %s166_s21 = sld [smem:[%s308_s4 + %s814_s29]] }
  0xce   : > { %s298_s9 = sshll.u32 %s166_s21, 4 }
  0xcf   : > { %s168_s14 = scalar_lea.hbm %s810_s1, %s298_s9 }
  0xd0   : > { %s536_s15 = scalar_lea.hbm %s168_s14, 16  ;;  %p541_p7 = scmp.lt.u32.totalorder %s168_s14, %s810_s1 }
  0xd1   : > { %p537_p4 = scmp.ne.s32.totalorder %s168_s14, %s536_s15  ;;  %p542_p8 = scmp.lt.u32.totalorder %s649_s3, %s536_s15 }
  0xd2   : > { %p544_p10 = scmp.lt.u32.totalorder %s536_s15, %s168_s14 }
  0xd3   : > { %p538_p5 = pnand %p537_p4, %p769_p3  ;;  %p543_p9 = por %p542_p8, %p541_p7 }
  0xd5   : > { %p539_p6 = pneg %p538_p5  ;;  %p545_p11 = por %p544_p10, %p543_p9 }
  0xd7   : > { %p546_p12 = pnand %p545_p11, %p539_p6 }
  0xd9   : > { %549 = shalt.err (!%p546_p12)  }
  0xda   : > { %s550_s17 = scalar_lea.vmem %s178_s8, 16  ;;  %p557_p2 = scmp.lt.s32.totalorder %s178_s8, %s632_s16 }
  0xdb   : > { %p551_p13 = scmp.ne.s32.totalorder %s178_s8, %s550_s17  ;;  %p558_p4 = scmp.lt.s32.totalorder %s658_s7, %s550_s17 }
  0xdd   : > { %p552_p0 = pnand %p551_p13, %p769_p3  ;;  %p559_p5 = por %p558_p4, %p557_p2 }
  0xdf   : > { %p553_p1 = pneg %p552_p0 }
  0xe1   : > { %p560_p7 = pnand %p559_p5, %p553_p1 }
  0xe3   : > { %563 = shalt.err (!%p560_p7)  }
  0xe4   : > { %310 = dma.hbm_to_vmem [thread:$0]  (%p769_p3), %s168_s14, 16, %s178_s8, %s764_s28 }
  0xe5   : > { %s153_s26 = sadd.s32 1, %s598_s26  }
  0xe6   : > { %p150_p6 = scmp.ge.s32.totalorder %s153_s26, 16  }
  0xe7   :  { %v181_v0 = vld [vmem:[#allocation2] sm:$0xff] (%p150_p6)  ;;  %v182_v1 = vld [vmem:[#allocation2 + $0x8] sm:$0xff] (%p150_p6)  ;;  %s609_s0 = smov (%p150_p6), [#allocation6]  }
  0xe8   :  { %152 = sbr.rel (!%p150_p6) target bundleno = 192 (0xc0), region = 99  ;;  %183 = vst [vmem:[#allocation6] sm:$0xff] (%p150_p6), %v181_v0  ;;  %184 = vst [vmem:[#allocation6 + $0x8] sm:$0xff] (%p150_p6), %v182_v1  ;;  %s190_s19 = sshll.u32 (%p150_p6), %s609_s0, 4  ;;  %s191_s19 = int_to_ptr.vmem [resolvable:$true] %s190_s19 }
  0xe9   :  { %s564_s20 = scalar_lea.vmem (%p150_p6), %s191_s19, 256  ;;  %p569_p9 = scmp.lt.s32.totalorder (%p150_p6), %s191_s19, %s191_s19 }
  0xea   :  { %p565_p8 = scmp.ne.s32.totalorder (%p150_p6), %s191_s19, %s564_s20  ;;  %p570_p10 = scmp.lt.s32.totalorder (%p150_p6), %s564_s20, %s564_s20 }
  0xec   :  { %p571_p11 = por (%p150_p6), %p570_p10, %p569_p9 }
  0xee   :  { %p572_p12 = pnand (%p150_p6), %p571_p11, %p565_p8 }
  0xf0   :  { %575 = shalt.err (!%p572_p12)
}
  0xf1   :  { %s576_s25 = scalar_lea.hbm %s811_s2, 256 }
  0xf2   :  { %p577_p3 = scmp.ne.s32.totalorder %s811_s2, %s576_s25  ;;  %p580_p13 = scmp.lt.u32.totalorder %s576_s25, %s811_s2 }
  0xf4   :  { %p582_p0 = pnand %p580_p13, %p577_p3 }
  0xf6   :  { %585 = shalt.err (!%p582_p0)
}
  0xf7   :  { %s610_s3 = smov 128   ;;  %s611_s7 = smov 8  }
  0xf8   :  { %196 = dma.vmem_to_hbm [thread:$0]  %s191_s19, 256, %s811_s2, [#allocation7], %s610_s3, %s610_s3, %s611_s7  }
  0xf9   :  { %594 = dma.done.wait [#allocation7], 256  }
  0xfa   :  { %595 = vsyncadd [#allocation7], 4294967040 }
  0xfb   :  { %200 = vsyncpa [#allocation7], 1 }
  0xfc   :  { %201 = vsyncmov [#allocation3] }
  0xff   :  { %s202_s28 = vpop.sfrf %201 }
 0x100   :  { %p299_p1 = scmp.ne.s32.totalorder %s202_s28, 0 }
 0x102   :  { %206 = shalt.err (%p299_p1)  }
 0x103   :  { %208 = vsyncmov [#allocation3 + $0x1] }
 0x106   :  { %s209_s29 = vpop.sfrf %208 }
 0x107   :  { %p300_p2 = scmp.ne.s32.totalorder %s209_s29, 0 }
 0x109   :  { %213 = shalt.err (%p300_p2)  }
 0x10a   :  { %215 = vsyncmov [#allocation3 + $0x2] }
 0x10d   :  { %s216_s30 = vpop.sfrf %215 }
 0x10e   :  { %p301_p4 = scmp.ne.s32.totalorder %s216_s30, 0 }
 0x110   :  { %220 = shalt.err (%p301_p4)  }
 0x111   :  { %222 = vsyncmov [#allocation3 + $0x3] }
 0x114   :  { %s223_s4 = vpop.sfrf %222 }
 0x115   :  { %p302_p5 = scmp.ne.s32.totalorder %s223_s4, 0 }
 0x117   :  { %227 = shalt.err (%p302_p5)  }
 0x118   :  { %229 = vsyncmov [#allocation3 + $0x4] }
 0x11b   :  { %s230_s2 = vpop.sfrf %229 }
 0x11c   :  { %p303_p7 = scmp.ne.s32.totalorder %s230_s2, 0 }
 0x11e   :  { %234 = shalt.err (%p303_p7)  }
 0x11f   :  { %236 = vsyncmov [#allocation3 + $0x5] }
 0x122   :  { %s237_s5 = vpop.sfrf %236 }
 0x123   :  { %p304_p6 = scmp.ne.s32.totalorder %s237_s5, 0 }
 0x125   :  { %241 = shalt.err (%p304_p6)  }
 0x126   :  { %243 = vsyncmov [#allocation3 + $0x6] }
 0x129   :  { %s244_s6 = vpop.sfrf %243 }
 0x12a   :  { %p305_p8 = scmp.ne.s32.totalorder %s244_s6, 0 }
 0x12c   :  { %248 = shalt.err (%p305_p8)  }
 0x12d   :  { %250 = vsyncmov [#allocation3 + $0x7] }
 0x130   :  { %s251_s21 = vpop.sfrf %250 }
 0x131   :  { %p306_p9 = scmp.ne.s32.totalorder %s251_s21, 0 }
 0x133   :  { %255 = shalt.err (%p306_p9)  }

</bundles_post_ra>
